<compile_context>
chip_gen: v6e
topology: v6e:2x2x1
jax: 0.10.0
libtpu: 0.0.40
codegen_flags: <defaults>
</compile_context>

<pallas_src>
import functools

import jax
import jax.numpy as jnp
from jax.experimental import pallas as pl
from jax.experimental.pallas import tpu as pltpu

_L_DEFAULT = -0.1
_R_DEFAULT = 1.1

_LANES = 1024          # lane-dense output slab width (multiple of 128, >= 512)
_MAX_BLOCK_ROWS = 512  # 512 x 1024 f32 = 2 MiB per block


def _wrap_i32(v):
    """Wrap a Python int to signed 32-bit (two's complement)."""
    return ((int(v) + 0x80000000) & 0xFFFFFFFF) - 0x80000000


def _uniform_01(shape, row0, lanes, seed):
    """Counter-based uniform noise in [0, 1): lowbias32 hash of the global
    element index, done entirely in int32 (portable: VPU int ops only)."""
    r = jax.lax.broadcasted_iota(jnp.int32, shape, 0) + row0
    c = jax.lax.broadcasted_iota(jnp.int32, shape, 1)
    x = r * jnp.int32(lanes) + c
    # mix in the seed (golden-ratio constant)
    x = x ^ jnp.int32(_wrap_i32(seed * 0x9E3779B9))
    # lowbias32 finalizer; logical right shifts emulated via arithmetic shift + mask
    x = x ^ ((x >> 16) & jnp.int32(0x0000FFFF))
    x = x * jnp.int32(_wrap_i32(0x7FEB352D))
    x = x ^ ((x >> 15) & jnp.int32(0x0001FFFF))
    x = x * jnp.int32(_wrap_i32(0x846CA68B))
    x = x ^ ((x >> 16) & jnp.int32(0x0000FFFF))
    # 24 random bits -> float in [0, 1 - 2^-24]
    bits24 = (x >> 8) & jnp.int32(0x00FFFFFF)
    return bits24.astype(jnp.float32) * jnp.float32(1.0 / (1 << 24))


def _hard_kuma_kernel(a_ref, b_ref, o_ref, *, l, r, seed):
    block_rows, lanes = a_ref.shape
    row0 = pl.program_id(0) * block_rows

    u = _uniform_01((block_rows, lanes), row0, lanes, seed)

    a = a_ref[...].astype(jnp.float32)
    b = b_ref[...].astype(jnp.float32)

    # 1/(exp(x) + 1e-8) -> exp(-x): the eps in the reference only guards
    # exp(x) ~ 0 (x << -18), irrelevant for logits; saves two divisions on
    # the saturating EUP/VPU path.
    inv_a = jnp.exp(-a)
    inv_b = jnp.exp(-b)

    # w = (1 - u) ** inv_b ; u < 1 so log(1 - u) is finite and <= 0, w in (0, 1].
    w = jnp.exp(inv_b * jnp.log(1.0 - u))
    # k = (1 - w) ** inv_a ; w == 1 -> log(0) = -inf -> k = 0 (matches reference).
    k = jnp.exp(inv_a * jnp.log(1.0 - w))

    # Rectifier: stretch to [l, r], then hardtanh to [0, 1].
    t = l + (r - l) * k
    o_ref[...] = jnp.clip(t, 0.0, 1.0).astype(o_ref.dtype)


def hard_kuma_binarizer(a, b, *, l=_L_DEFAULT, r=_R_DEFAULT, seed=0):
    """Pallas TPU implementation of HardKumaBinarizer.forward(a, b, l, r)."""
    assert a.shape == b.shape, "a and b must have identical shapes"
    orig_shape = a.shape
    out_dtype = a.dtype
    n = a.size

    rows = max(pl.cdiv(n, _LANES), 1)
    padded = rows * _LANES

    a_flat = a.reshape(-1)
    b_flat = b.reshape(-1)
    if padded != n:  # pad only when needed (pad = full extra copy otherwise)
        a_flat = jnp.pad(a_flat, (0, padded - n))
        b_flat = jnp.pad(b_flat, (0, padded - n))
    a2 = a_flat.reshape(rows, _LANES)
    b2 = b_flat.reshape(rows, _LANES)

    # Fat, lane-dense blocks; block == full array when it is already small.
    block_rows = rows if rows <= _MAX_BLOCK_ROWS else _MAX_BLOCK_ROWS
    grid = (pl.cdiv(rows, block_rows),)

    kernel = functools.partial(
        _hard_kuma_kernel, l=float(l), r=float(r), seed=int(seed)
    )
    spec = pl.BlockSpec((block_rows, _LANES), lambda i: (i, 0))

    out = pl.pallas_call(
        kernel,
        out_shape=jax.ShapeDtypeStruct((rows, _LANES), out_dtype),
        grid=grid,
        in_specs=[spec, spec],
        out_specs=spec,
        compiler_params=pltpu.CompilerParams(
            dimension_semantics=("parallel",),     # shard across v7x's 2 TCs
            vmem_limit_bytes=48 * 1024 * 1024,     # headroom under v7x's 64 MiB
        ),
    )(a2, b2)

    return out.reshape(-1)[:n].reshape(orig_shape)


if __name__ == "__main__":
    key = jax.random.PRNGKey(0)
    ka, kb = jax.random.split(key)

    # Small NCHW-shaped "logit" inputs, consistent with how the module is used.
    shape = (2, 4, 16, 16)
    a = jax.random.normal(ka, shape, dtype=jnp.float32) * 0.5
    b = jax.random.normal(kb, shape, dtype=jnp.float32) * 0.5

    t = hard_kuma_binarizer(a, b, l=-0.1, r=1.1, seed=0)
    t = jax.block_until_ready(t)

    assert t.shape == shape
    assert t.dtype == a.dtype
    assert bool(jnp.all(t >= 0.0)) and bool(jnp.all(t <= 1.0))
    assert bool(jnp.all(jnp.isfinite(t)))
    print("KERNEL_OK")
</pallas_src>

<mosaic_0001>
module attributes {stable_mosaic.version = 11 : i64} {
  func.func @_hard_kuma_kernel(%arg0: i32, %arg1: memref<2x1024xf32, #tpu.memory_space<vmem>>, %arg2: memref<2x1024xf32, #tpu.memory_space<vmem>>, %arg3: memref<2x1024xf32, #tpu.memory_space<vmem>>) attributes {dimension_semantics = [#tpu.dimension_semantics<parallel>], iteration_bounds = array<i64: 1>, scalar_prefetch = 0 : i64, scratch_operands = 0 : i64, tpu.core_type = #tpu.core_type<tc>, window_params = [{transform_indices = @transform_0, window_bounds = array<i64: 2, 1024>}, {transform_indices = @transform_1, window_bounds = array<i64: 2, 1024>}, {transform_indices = @transform_2, window_bounds = array<i64: 2, 1024>}]} {
    %c2_i32 = arith.constant 2 : i32
    %0 = arith.muli %arg0, %c2_i32 : i32
    %1 = tpu.iota {dimensions = array<i32: 0>} : vector<2x1024xi32>
    %2 = vector.broadcast %0 : i32 to vector<2x1024xi32>
    %3 = arith.addi %1, %2 : vector<2x1024xi32>
    %4 = tpu.iota {dimensions = array<i32: 1>} : vector<2x1024xi32>
    %c1024_i32 = arith.constant 1024 : i32
    %5 = vector.broadcast %c1024_i32 : i32 to vector<2x1024xi32>
    %6 = arith.muli %3, %5 : vector<2x1024xi32>
    %7 = arith.addi %6, %4 : vector<2x1024xi32>
    %c0_i32 = arith.constant 0 : i32
    %8 = vector.broadcast %c0_i32 : i32 to vector<2x1024xi32>
    %9 = arith.xori %7, %8 : vector<2x1024xi32>
    %c16_i32 = arith.constant 16 : i32
    %10 = vector.broadcast %c16_i32 : i32 to vector<2x1024xi32>
    %11 = arith.shrsi %9, %10 : vector<2x1024xi32>
    %c65535_i32 = arith.constant 65535 : i32
    %12 = vector.broadcast %c65535_i32 : i32 to vector<2x1024xi32>
    %13 = arith.andi %11, %12 : vector<2x1024xi32>
    %14 = arith.xori %9, %13 : vector<2x1024xi32>
    %c2146121005_i32 = arith.constant 2146121005 : i32
    %15 = vector.broadcast %c2146121005_i32 : i32 to vector<2x1024xi32>
    %16 = arith.muli %14, %15 : vector<2x1024xi32>
    %c15_i32 = arith.constant 15 : i32
    %17 = vector.broadcast %c15_i32 : i32 to vector<2x1024xi32>
    %18 = arith.shrsi %16, %17 : vector<2x1024xi32>
    %c131071_i32 = arith.constant 131071 : i32
    %19 = vector.broadcast %c131071_i32 : i32 to vector<2x1024xi32>
    %20 = arith.andi %18, %19 : vector<2x1024xi32>
    %21 = arith.xori %16, %20 : vector<2x1024xi32>
    %c-2073254261_i32 = arith.constant -2073254261 : i32
    %22 = vector.broadcast %c-2073254261_i32 : i32 to vector<2x1024xi32>
    %23 = arith.muli %21, %22 : vector<2x1024xi32>
    %c16_i32_0 = arith.constant 16 : i32
    %24 = vector.broadcast %c16_i32_0 : i32 to vector<2x1024xi32>
    %25 = arith.shrsi %23, %24 : vector<2x1024xi32>
    %c65535_i32_1 = arith.constant 65535 : i32
    %26 = vector.broadcast %c65535_i32_1 : i32 to vector<2x1024xi32>
    %27 = arith.andi %25, %26 : vector<2x1024xi32>
    %28 = arith.xori %23, %27 : vector<2x1024xi32>
    %c8_i32 = arith.constant 8 : i32
    %29 = vector.broadcast %c8_i32 : i32 to vector<2x1024xi32>
    %30 = arith.shrsi %28, %29 : vector<2x1024xi32>
    %c16777215_i32 = arith.constant 16777215 : i32
    %31 = vector.broadcast %c16777215_i32 : i32 to vector<2x1024xi32>
    %32 = arith.andi %30, %31 : vector<2x1024xi32>
    %33 = arith.sitofp %32 : vector<2x1024xi32> to vector<2x1024xf32>
    %cst = arith.constant 5.96046448E-8 : f32
    %34 = vector.broadcast %cst : f32 to vector<2x1024xf32>
    %35 = arith.mulf %33, %34 : vector<2x1024xf32>
    %c0 = arith.constant 0 : index
    %c0_2 = arith.constant 0 : index
    %36 = vector.load %arg1[%c0, %c0_2] : memref<2x1024xf32, #tpu.memory_space<vmem>>, vector<2x1024xf32>
    %c0_3 = arith.constant 0 : index
    %c0_4 = arith.constant 0 : index
    %37 = vector.load %arg2[%c0_3, %c0_4] : memref<2x1024xf32, #tpu.memory_space<vmem>>, vector<2x1024xf32>
    %cst_5 = arith.constant 0.000000e+00 : f32
    %38 = vector.broadcast %cst_5 : f32 to vector<2x1024xf32>
    %39 = arith.subf %38, %36 : vector<2x1024xf32>
    %40 = math.exp %39 : vector<2x1024xf32>
    %cst_6 = arith.constant 0.000000e+00 : f32
    %41 = vector.broadcast %cst_6 : f32 to vector<2x1024xf32>
    %42 = arith.subf %41, %37 : vector<2x1024xf32>
    %43 = math.exp %42 : vector<2x1024xf32>
    %cst_7 = arith.constant 1.000000e+00 : f32
    %44 = vector.broadcast %cst_7 : f32 to vector<2x1024xf32>
    %45 = arith.subf %44, %35 : vector<2x1024xf32>
    %46 = math.log %45 : vector<2x1024xf32>
    %47 = arith.mulf %43, %46 : vector<2x1024xf32>
    %48 = math.exp %47 : vector<2x1024xf32>
    %cst_8 = arith.constant 1.000000e+00 : f32
    %49 = vector.broadcast %cst_8 : f32 to vector<2x1024xf32>
    %50 = arith.subf %49, %48 : vector<2x1024xf32>
    %51 = math.log %50 : vector<2x1024xf32>
    %52 = arith.mulf %40, %51 : vector<2x1024xf32>
    %53 = math.exp %52 : vector<2x1024xf32>
    %cst_9 = arith.constant 1.200000e+00 : f32
    %54 = vector.broadcast %cst_9 : f32 to vector<2x1024xf32>
    %55 = arith.mulf %54, %53 : vector<2x1024xf32>
    %cst_10 = arith.constant -1.000000e-01 : f32
    %56 = vector.broadcast %cst_10 : f32 to vector<2x1024xf32>
    %57 = arith.addf %56, %55 : vector<2x1024xf32>
    %cst_11 = arith.constant 0.000000e+00 : f32
    %cst_12 = arith.constant 1.000000e+00 : f32
    %58 = vector.broadcast %cst_11 : f32 to vector<2x1024xf32>
    %59 = arith.maximumf %58, %57 : vector<2x1024xf32>
    %60 = vector.broadcast %cst_12 : f32 to vector<2x1024xf32>
    %61 = arith.minimumf %60, %59 : vector<2x1024xf32>
    %c0_13 = arith.constant 0 : index
    %c0_14 = arith.constant 0 : index
    %62 = vector.load %arg3[%c0_13, %c0_14] : memref<2x1024xf32, #tpu.memory_space<vmem>>, vector<2x1024xf32>
    tpu.vector_store %arg3[%c0_13, %c0_14], %61 {strides = array<i32>} : memref<2x1024xf32, #tpu.memory_space<vmem>>, vector<2x1024xf32>,
    return
  }
  func.func @transform_0(%arg0: i32) -> (i32, i32) {
    %c0_i32 = arith.constant 0 : i32
    %c0_i32_0 = arith.constant 0 : i32
    return %arg0, %c0_i32 : i32, i32
  }
  func.func @transform_1(%arg0: i32) -> (i32, i32) {
    %c0_i32 = arith.constant 0 : i32
    %c0_i32_0 = arith.constant 0 : i32
    return %arg0, %c0_i32 : i32, i32
  }
  func.func @transform_2(%arg0: i32) -> (i32, i32) {
    %c0_i32 = arith.constant 0 : i32
    %c0_i32_0 = arith.constant 0 : i32
    return %arg0, %c0_i32 : i32, i32
  }
}

</mosaic_0001>

<bundles_post_ra>
// kernel: tpu_custom_call.1
= control target key start
LH: loop header
LB: loop body
LE: loop exit
PB: predicated region body
PF: predicated region fallthrough
CT: control target
= control target key end

     0   :  { %7 = vsyncpa [#allocation3], 0  ;;  %s482_s0 = inlined_call_operand.hbm [shape: f32[2,1024], index: 0, kind: input, shape index: {}]   ;;  %s483_s1 = inlined_call_operand.hbm [shape: f32[2,1024], index: 1, kind: input, shape index: {}]   ;;  %s484_s2 = inlined_call_operand.hbm [shape: f32[2,1024], index: 2, kind: output, shape index: {}]  }
   0x1   :  { %8 = vsyncpa [#allocation6], 0 }
   0x2   :  { %9 = vsyncpa [#allocation4], 0  ;;  %s445_s9 = smov [#allocation2]   ;;  %s446_s11 = smov [#allocation5]  }
   0x3   :  { %s16_s10 = sshll.u32 %s445_s9, 4  ;;  %s26_s12 = sshll.u32 %s446_s11, 4  ;;  %s17_s10 = int_to_ptr.vmem [resolvable:$true] %s16_s10  ;;  %s27_s12 = int_to_ptr.vmem [resolvable:$true] %s26_s12 }
   0x4   :  { %s387_s13 = scalar_lea.vmem %s17_s10, 256  ;;  %p392_p1 = scmp.lt.s32.totalorder %s17_s10, %s17_s10 }
   0x5   :  { %p388_p0 = scmp.ne.s32.totalorder %s17_s10, %s387_s13  ;;  %p393_p2 = scmp.lt.s32.totalorder %s387_s13, %s387_s13 }
   0x7   :  { %p394_p3 = por %p393_p2, %p392_p1 }
   0x9   :  { %p395_p4 = pnand %p394_p3, %p388_p0 }
   0xb   :  { %398 = shalt.err (!%p395_p4)
}
   0xc   :  { %19 = dma.hbm_to_vmem [thread:$0]  %s482_s0, 256, %s17_s10, [#allocation3]  }
   0xd   :  { %s407_s16 = scalar_lea.vmem %s27_s12, 256  ;;  %p412_p6 = scmp.lt.s32.totalorder %s27_s12, %s27_s12 }
   0xe   :  { %p408_p5 = scmp.ne.s32.totalorder %s27_s12, %s407_s16  ;;  %p413_p7 = scmp.lt.s32.totalorder %s407_s16, %s407_s16 }
  0x10   :  { %p414_p8 = por %p413_p7, %p412_p6 }
  0x12   :  { %p415_p9 = pnand %p414_p8, %p408_p5 }
  0x14   :  { %418 = shalt.err (!%p415_p9)
}
  0x15   :  { %29 = dma.hbm_to_vmem [thread:$0]  %s483_s1, 256, %s27_s12, [#allocation6]  }
  0x16   :  { %439 = dma.done.wait [#allocation3], 256  }
  0x17   :  { %440 = vsyncadd [#allocation3], 4294967040 }
  0x18   :  { %441 = dma.done.wait [#allocation6], 256  }
  0x19   :  { %442 = vsyncadd [#allocation6], 4294967040  ;;  %v37_v0 = vlaneseq  ;;  %v473_v28 = vld [vmem:[#allocation5] sm:$0xff]  ;;  %s448_s0 = smov [#allocation7]  }
  0x1a   :  { %v189_v40 = vsub.f32 0.0, %v473_v28  ;;  %s297_s1 = sshll.u32 %s448_s0, 4  ;;  %s298_s1 = int_to_ptr.vmem [resolvable:$true] %s297_s1 }
  0x1b   :  { %v470_v1 = vshrl.u32 %v37_v0, 7  ;;  %v42_v2 = vand.u32 127, %v37_v0  ;;  %s419_s19 = scalar_lea.vmem %s298_s1, 256  ;;  %p424_p11 = scmp.lt.s32.totalorder %s298_s1, %s298_s1 }
  0x1c   :  { %p420_p10 = scmp.ne.s32.totalorder %s298_s1, %s419_s19  ;;  %p425_p12 = scmp.lt.s32.totalorder %s419_s19, %s419_s19 }
  0x1d   :  { %v43_v3 = vadd.s32 128, %v42_v2  ;;  %v44_v4 = vadd.s32 256, %v42_v2  ;;  %v45_v5 = vadd.s32 384, %v42_v2  ;;  %v50_v6 = vmul.u32 1024, %v470_v1 }
  0x1e   :  { %v46_v7 = vadd.s32 512, %v42_v2  ;;  %v47_v8 = vadd.s32 640, %v42_v2  ;;  %v48_v9 = vadd.s32 768, %v42_v2  ;;  %v49_v14 = vadd.s32 896, %v42_v2  ;;  %p426_p13 = por %p425_p12, %p424_p11 }
  0x1f   :  { %v51_v10 = vadd.s32 %v50_v6, %v42_v2  ;;  %v52_v11 = vadd.s32 %v50_v6, %v43_v3  ;;  %v53_v12 = vadd.s32 %v50_v6, %v44_v4  ;;  %v54_v13 = vadd.s32 %v50_v6, %v45_v5 }
  0x20   :  { %v55_v15 = vadd.s32 %v50_v6, %v46_v7  ;;  %v56_v16 = vadd.s32 %v50_v6, %v47_v8  ;;  %v57_v17 = vadd.s32 %v50_v6, %v48_v9  ;;  %v58_v22 = vadd.s32 %v50_v6, %v49_v14  ;;  %p427_p0 = pnand %p426_p13, %p420_p10 }
  0x21   :  { %v307_v18 = vshrl.u32 %v51_v10, 16  ;;  %v308_v19 = vshrl.u32 %v52_v11, 16  ;;  %v309_v20 = vshrl.u32 %v53_v12, 16  ;;  %v310_v21 = vshrl.u32 %v54_v13, 16 }
  0x22   :  { %v311_v23 = vshrl.u32 %v55_v15, 16  ;;  %v312_v29 = vshrl.u32 %v56_v16, 16  ;;  %v313_v30 = vshrl.u32 %v57_v17, 16  ;;  %v314_v33 = vshrl.u32 %v58_v22, 16 }
  0x23   :  { %v75_v24 = vxor.u32 %v307_v18, %v51_v10  ;;  %v76_v25 = vxor.u32 %v308_v19, %v52_v11  ;;  %v77_v26 = vxor.u32 %v309_v20, %v53_v12  ;;  %v78_v27 = vxor.u32 %v310_v21, %v54_v13 }
  0x24   :  { %v79_v34 = vxor.u32 %v311_v23, %v55_v15  ;;  %v80_v37 = vxor.u32 %v312_v29, %v56_v16  ;;  %v81_v41 = vxor.u32 %v313_v30, %v57_v17  ;;  %v82_v44 = vxor.u32 %v314_v33, %v58_v22 }
  0x25   :  { %v83_v31 = vmul.u32 2146121005, %v75_v24  ;;  %v84_v32 = vmul.u32 2146121005, %v76_v25 }
  0x26   :  { %v85_v35 = vmul.u32 2146121005, %v77_v26  ;;  %v86_v36 = vmul.u32 2146121005, %v78_v27 }
  0x27   :  { %v315_v38 = vshrl.u32 %v83_v31, 15  ;;  %v316_v39 = vshrl.u32 %v84_v32, 15  ;;  %v87_v45 = vmul.u32 2146121005, %v79_v34  ;;  %v88_v48 = vmul.u32 2146121005, %v80_v37 }
  0x28   :  { %v317_v42 = vshrl.u32 %v85_v35, 15  ;;  %v318_v43 = vshrl.u32 %v86_v36, 15  ;;  %v89_v49 = vmul.u32 2146121005, %v81_v41  ;;  %v90_v52 = vmul.u32 2146121005, %v82_v44 }
  0x29   :  { %v107_v46 = vxor.u32 %v315_v38, %v83_v31  ;;  %v108_v47 = vxor.u32 %v316_v39, %v84_v32  ;;  %v319_v53 = vshrl.u32 %v87_v45, 15  ;;  %v320_v56 = vshrl.u32 %v88_v48, 15 }
  0x2a   :  { %v109_v50 = vxor.u32 %v317_v42, %v85_v35  ;;  %v110_v51 = vxor.u32 %v318_v43, %v86_v36  ;;  %v321_v57 = vshrl.u32 %v89_v49, 15  ;;  %v322_v60 = vshrl.u32 %v90_v52, 15 }
  0x2b   :  { %v115_v54 = vmul.u32 2221713035, %v107_v46  ;;  %v116_v55 = vmul.u32 2221713035, %v108_v47  ;;  %v111_v61 = vxor.u32 %v319_v53, %v87_v45  ;;  %v112_v0 = vxor.u32 %v320_v56, %v88_v48 }
  0x2c   :  { %v117_v58 = vmul.u32 2221713035, %v109_v50  ;;  %v118_v59 = vmul.u32 2221713035, %v110_v51  ;;  %v113_v2 = vxor.u32 %v321_v57, %v89_v49  ;;  %v114_v5 = vxor.u32 %v322_v60, %v90_v52 }
  0x2d   :  { %v323_v62 = vshrl.u32 %v115_v54, 16  ;;  %v324_v63 = vshrl.u32 %v116_v55, 16  ;;  %v119_v6 = vmul.u32 2221713035, %v111_v61  ;;  %v120_v9 = vmul.u32 2221713035, %v112_v0 }
  0x2e   :  { %v325_v3 = vshrl.u32 %v117_v58, 16  ;;  %v326_v4 = vshrl.u32 %v118_v59, 16  ;;  %v121_v10 = vmul.u32 2221713035, %v113_v2  ;;  %v122_v13 = vmul.u32 2221713035, %v114_v5 }
  0x2f   :  { %v139_v7 = vxor.u32 %v323_v62, %v115_v54  ;;  %v140_v8 = vxor.u32 %v324_v63, %v116_v55  ;;  %v327_v14 = vshrl.u32 %v119_v6, 16  ;;  %v328_v17 = vshrl.u32 %v120_v9, 16  ;;  %v182_v55 = vld [vmem:[#allocation5 + $0x8] sm:$0xff] }
  0x30   :  { %v141_v11 = vxor.u32 %v325_v3, %v117_v58  ;;  %v142_v12 = vxor.u32 %v326_v4, %v118_v59  ;;  %v329_v18 = vshrl.u32 %v121_v10, 16  ;;  %v330_v21 = vshrl.u32 %v122_v13, 16 }
  0x31   :  { %v331_v15 = vshrl.u32 %v139_v7, 8  ;;  %v332_v16 = vshrl.u32 %v140_v8, 8  ;;  %v143_v22 = vxor.u32 %v327_v14, %v119_v6  ;;  %v144_v25 = vxor.u32 %v328_v17, %v120_v9 }
  0x32   :  { %v333_v19 = vshrl.u32 %v141_v11, 8  ;;  %v334_v20 = vshrl.u32 %v142_v12, 8  ;;  %v145_v26 = vxor.u32 %v329_v18, %v121_v10  ;;  %v146_v30 = vxor.u32 %v330_v21, %v122_v13 }
  0x33   :  { %v163_v23 = vcvt.s32.f32 %v331_v15  ;;  %v164_v24 = vcvt.s32.f32 %v332_v16  ;;  %v335_v31 = vshrl.u32 %v143_v22, 8  ;;  %v336_v34 = vshrl.u32 %v144_v25, 8 }
  0x34   :  { %v165_v27 = vcvt.s32.f32 %v333_v19  ;;  %v166_v29 = vcvt.s32.f32 %v334_v20  ;;  %v337_v35 = vshrl.u32 %v145_v26, 8  ;;  %v338_v38 = vshrl.u32 %v146_v30, 8  ;;  %v179_v30 = vld [vmem:[#allocation2] sm:$0xff] }
  0x35   :  { %v171_v32 = vmul.f32 5.9604645e-08, %v163_v23  ;;  %v172_v33 = vmul.f32 5.9604645e-08, %v164_v24  ;;  %v167_v39 = vcvt.s32.f32 %v335_v31  ;;  %v168_v43 = vcvt.s32.f32 %v336_v34 }
  0x36   :  { %v173_v36 = vmul.f32 5.9604645e-08, %v165_v27  ;;  %v174_v37 = vmul.f32 5.9604645e-08, %v166_v29  ;;  %v169_v44 = vcvt.s32.f32 %v337_v35  ;;  %v170_v47 = vcvt.s32.f32 %v338_v38 }
  0x37   :  { %v195_v41 = vsub.f32 1.0, %v171_v32  ;;  %v196_v42 = vsub.f32 1.0, %v172_v33  ;;  %v175_v48 = vmul.f32 5.9604645e-08, %v167_v39  ;;  %v176_v49 = vmul.f32 5.9604645e-08, %v168_v43  ;;  %v180_v33 = vld [vmem:[#allocation2 + $0x8] sm:$0xff] }
  0x38   :  { %v197_v45 = vsub.f32 1.0, %v173_v36  ;;  %v198_v46 = vsub.f32 1.0, %v174_v37  ;;  %v177_v50 = vmul.f32 5.9604645e-08, %v169_v44  ;;  %v191_v51 = vmul.f32 1.442695, %v189_v40 }
  0x39   :  { %343 = vlog2.f32 %v195_v41  ;;  %v178_v52 = vmul.f32 5.9604645e-08, %v170_v47  ;;  %v199_v53 = vsub.f32 1.0, %v175_v48  ;;  %v200_v54 = vsub.f32 1.0, %v176_v49 }
  0x3a   :  { %345 = vlog2.f32 %v196_v42  ;;  %v201_v56 = vsub.f32 1.0, %v177_v50  ;;  %v447_v58 = vmov 1983009808   ;;  %v190_v60 = vsub.f32 0.0, %v182_v55 }
  0x3b   :  { %347 = vlog2.f32 %v197_v45  ;;  %v202_v57 = vsub.f32 1.0, %v178_v52  ;;  %v230_v59 = vunpack.c.l.s4 %v447_v58  ;;  %v183_v32 = vsub.f32 0.0, %v179_v30 }
  0x3c   :  { %349 = vlog2.f32 %v198_v46  ;;  %v193_v28 = vmul.f32 1.442695, %v190_v60  ;;  %v184_v36 = vsub.f32 0.0, %v180_v33 }
  0x3d   :  { %351 = vpow2.f32 %v191_v51  ;;  %v231_v61 = vunpack.c.0.s8 %v230_v59  ;;  %v185_v34 = vmul.f32 1.442695, %v183_v32 }
  0x3e   :  { %353 = vlog2.f32 %v199_v53  ;;  %v187_v38 = vmul.f32 1.442695, %v184_v36 }
  0x3f   :  { %355 = vlog2.f32 %v200_v54  ;;  %v234_v3 = vsub.s32 %v231_v61, %v470_v1 }
  0x40   :  { %357 = vlog2.f32 %v201_v56 }
  0x41   :  { %359 = vlog2.f32 %v202_v57 }
  0x42   :  { %361 = vpow2.f32 %v193_v28 }
  0x46   :  { %v344_v40 = vpop.eup %343 }
  0x47   :  { %v346_v62 = vpop.eup %345  ;;  %v204_v63 = vmul.f32 0.6931472, %v344_v40 }
  0x48   :  { %v348_v0 = vpop.eup %347  ;;  %v206_v2 = vmul.f32 0.6931472, %v346_v62 }
  0x49   :  { %v350_v4 = vpop.eup %349  ;;  %v208_v5 = vmul.f32 0.6931472, %v348_v0 }
  0x4a   :  { %v210_v6 = vmul.f32 0.6931472, %v350_v4  ;;  %v227_v7 = vcombine.low %v204_v63, %v206_v2  ;;  %v352_v8 = vpop.eup %351 }
  0x4b   :  { %v354_v9 = vpop.eup %353 }
  0x4c   :  { %v228_v10 = vcombine.low %v208_v5, %v210_v6  ;;  %v235_v11 = vrot.slane %v227_v7, %v234_v3  ;;  %v356_v12 = vpop.eup %355  ;;  %v212_v13 = vmul.f32 0.6931472, %v354_v9 }
  0x4d   :  { %v358_v14 = vpop.eup %357  ;;  %v214_v16 = vmul.f32 0.6931472, %v356_v12 }
  0x4e   :  { %v242_v15 = vrot.slane %v228_v10, %v234_v3  ;;  %v360_v17 = vpop.eup %359  ;;  %v216_v18 = vmul.f32 0.6931472, %v358_v14 }
  0x4f   :  { %v218_v20 = vmul.f32 0.6931472, %v360_v17  ;;  %v244_v21 = vcombine.low %v212_v13, %v214_v16  ;;  %v362_v26 = vpop.eup %361 }
  0x50   :  { %v243_v19 = vcombine.low %v235_v11, %v242_v15 }
  0x51   :  { %v245_v22 = vcombine.low %v216_v18, %v218_v20  ;;  %v252_v23 = vrot.slane %v244_v21, %v234_v3 }
  0x52   :  { %v263_v1 = vmul.f32 %v352_v8, %v243_v19 }
  0x53   :  { %v259_v25 = vrot.slane %v245_v22, %v234_v3 }
  0x54   :  { %v265_v24 = vmul.f32 1.442695, %v263_v1 }
  0x55   :  { %v260_v27 = vcombine.low %v252_v23, %v259_v25 }
  0x56   :  { %363 = vpow2.f32 %v265_v24 }
  0x57   :  { %v264_v29 = vmul.f32 %v362_v26, %v260_v27 }
  0x59   :  { %v267_v31 = vmul.f32 1.442695, %v264_v29 }
  0x5b   :  { %365 = vpow2.f32 %v267_v31 }
  0x5c   :  { %367 = vpow2.f32 %v185_v34 }
  0x63   :  { %v364_v35 = vpop.eup %363 }
  0x64   :  { %v269_v37 = vsub.f32 1.0, %v364_v35 }
  0x66   :  { %369 = vlog2.f32 %v269_v37 }
  0x67   :  { %371 = vpow2.f32 %v187_v38 }
  0x68   :  { %v366_v39 = vpop.eup %365 }
  0x69   :  { %v270_v41 = vsub.f32 1.0, %v366_v39  ;;  %v368_v42 = vpop.eup %367 }
  0x6b   :  { %373 = vlog2.f32 %v270_v41 }
  0x73   :  { %v370_v43 = vpop.eup %369 }
  0x74   :  { %v272_v44 = vmul.f32 0.6931472, %v370_v43  ;;  %v372_v46 = vpop.eup %371 }
  0x76   :  { %v275_v45 = vmul.f32 %v368_v42, %v272_v44 }
  0x78   :  { %v277_v47 = vmul.f32 1.442695, %v275_v45  ;;  %v374_v48 = vpop.eup %373 }
  0x79   :  { %v274_v49 = vmul.f32 0.6931472, %v374_v48 }
  0x7a   :  { %375 = vpow2.f32 %v277_v47 }
  0x7b   :  { %v276_v50 = vmul.f32 %v372_v46, %v274_v49 }
  0x7d   :  { %v279_v51 = vmul.f32 1.442695, %v276_v50 }
  0x7f   :  { %377 = vpow2.f32 %v279_v51 }
  0x87   :  { %v376_v52 = vpop.eup %375 }
  0x88   :  { %v281_v53 = vmul.f32 1.2, %v376_v52 }
  0x8a   :  { %v283_v54 = vadd.f32 -0.1, %v281_v53 }
  0x8c   :  { %v285_v55 = vmax.f32 %v283_v54, 0.0  ;;  %v378_v56 = vpop.eup %377 }
  0x8d   :  { %v282_v58 = vmul.f32 1.2, %v378_v56 }
  0x8e   :  { %v287_v57 = vmin.f32 %v285_v55, 1.0 }
  0x8f   :  { %v284_v59 = vadd.f32 -0.1, %v282_v58 }
  0x90   :  { %289 = vst [vmem:[#allocation7] sm:$0xff] %v287_v57 }
  0x91   :  { %v286_v60 = vmax.f32 %v284_v59, 0.0 }
  0x93   :  { %v288_v61 = vmin.f32 %v286_v60, 1.0 }
  0x95   :  { %290 = vst [vmem:[#allocation7 + $0x8] sm:$0xff] %v288_v61 }
  0x96   :  { %430 = shalt.err (!%p427_p0)
}
  0x97   :  { %300 = dma.vmem_to_hbm [thread:$0]  %s298_s1, 256, %s484_s2, [#allocation4]  }
  0x98   :  { %443 = dma.done.wait [#allocation4], 256  }
  0x99   :  { %444 = vsyncadd [#allocation4], 4294967040 }
  0x9a   :  { %304 = vsyncpa [#allocation3], 1 }
  0x9b   :  { %305 = vsyncpa [#allocation6], 1 }
  0x9c   :  { %306 = vsyncpa [#allocation4], 1 }

</bundles_post_ra>
